<compile_context>
chip_gen: v6e
topology: v6e:2x2x1
jax: 0.10.0
libtpu: 0.0.40
codegen_flags: <defaults>
</compile_context>

<pallas_src>
import functools
import math

import jax
import jax.numpy as jnp
from jax import lax
from jax.experimental import pallas as pl
from jax.experimental.pallas import tpu as pltpu

LANES = 128


def _entropy_tile_kernel(x_ref, o_ref, *, valid_hw, rows_per_tile):
    """One (batch, spatial-tile) grid step.

    x_ref: (1, C, R, 128) input block (original dtype; widened in compute).
    o_ref: (1, 1, 1, 128) lane-dense partial entropy sums for this tile.
    """
    j = pl.program_id(1)  # spatial-tile index

    x = x_ref[...].astype(jnp.float32)          # widen only inside the math

    # Numerically stable fused entropy: ent = log(Z) - S/Z.
    # Algebraically identical to -(softmax * log_softmax).sum(channel), but with
    # a single exp pass and no channel-wide p / log_p temporaries.
    m = jnp.max(x, axis=1, keepdims=True)       # (1, 1, R, 128)  slab max (VPU)
    xs = x - m                                  # (1, C, R, 128)
    e = jnp.exp(xs)                             # single transcendental pass (EUP)
    z = jnp.sum(e, axis=1)                      # (1, R, 128)     slab sum (VPU)
    s = jnp.sum(xs * e, axis=1)                 # (1, R, 128)
    # approx=True can drift past 1e-5 tolerance; exact reciprocal is cheap here
    # because it only touches the already channel-reduced (R, 128) array.
    ent = jnp.log(z) - s * pl.reciprocal(z, approx=False)

    # Zero out positions that are wrapper padding (H*W rounded up to the
    # lane-dense (rows, 128) layout).
    r_idx = lax.broadcasted_iota(jnp.int32, (rows_per_tile, LANES), 0)
    l_idx = lax.broadcasted_iota(jnp.int32, (rows_per_tile, LANES), 1)
    pos = (j * rows_per_tile + r_idx) * LANES + l_idx
    ent = jnp.where((pos < valid_hw)[None], ent, 0.0)

    # Only a sublane (XLU) reduce per step; lanes stay dense for the store.
    o_ref[...] = jnp.sum(ent, axis=1).reshape(o_ref.shape)


def _choose_row_tile(num_ch, rows_total, itemsize,
                     target_block_bytes=2 * 1024 * 1024):
    """Rows of 128 lanes per block, sized so 2x(block) fits the smallest
    default scoped VMEM (v5e: 16 MiB) with lots of headroom."""
    bytes_per_row = num_ch * LANES * itemsize
    max_rows = max(8, target_block_bytes // bytes_per_row)
    if rows_total <= max_rows:
        return rows_total                 # single tile: block dim == full dim
    return max(8, (max_rows // 8) * 8)    # multiple tiles: multiple of 8


def entropy_min_loss(x, softmax_dim=1):
    """x: (N, C, *spatial). Returns scalar float32 mean per-pixel entropy."""
    if softmax_dim != 1:
        x = jnp.moveaxis(x, softmax_dim, 1)   # generic fallback (XLA transpose)

    N, C = int(x.shape[0]), int(x.shape[1])
    hw = int(math.prod(x.shape[2:])) if x.ndim > 2 else 1
    total = N * hw

    x_flat = x.reshape(N, C, hw)

    rows_total = -(-hw // LANES)
    rows_per_tile = _choose_row_tile(C, rows_total, jnp.dtype(x.dtype).itemsize)
    num_tiles = -(-rows_total // rows_per_tile)
    rows_padded = num_tiles * rows_per_tile
    hw_padded = rows_padded * LANES
    if hw_padded != hw:
        x_flat = jnp.pad(x_flat, ((0, 0), (0, 0), (0, hw_padded - hw)))
    x4 = x_flat.reshape(N, C, rows_padded, LANES)

    kernel = functools.partial(
        _entropy_tile_kernel, valid_hw=hw, rows_per_tile=rows_per_tile
    )

    partials = pl.pallas_call(
        kernel,
        out_shape=jax.ShapeDtypeStruct((N, num_tiles, 1, LANES), jnp.float32),
        grid=(N, num_tiles),
        in_specs=[
            pl.BlockSpec((1, C, rows_per_tile, LANES), lambda i, j: (i, 0, j, 0)),
        ],
        out_specs=pl.BlockSpec((1, 1, 1, LANES), lambda i, j: (i, j, 0, 0)),
        compiler_params=pltpu.CompilerParams(
            dimension_semantics=("parallel", "parallel"),
        ),
    )(x4)

    # Tiny final reduction + mean on the JAX side (padded lanes contribute 0).
    return jnp.sum(partials) / jnp.float32(total)


def _reference(x, softmax_dim=1):
    xf = x.astype(jnp.float32)
    logp = jax.nn.log_softmax(xf, axis=softmax_dim)
    p = jnp.exp(logp)
    return jnp.mean(-jnp.sum(p * logp, axis=softmax_dim))


if __name__ == "__main__":
    key = jax.random.PRNGKey(0)

    # Primary check: small NCHW logits, softmax over channels (axis 1).
    x = jax.random.normal(key, (2, 4, 16, 16), dtype=jnp.float32)
    loss = entropy_min_loss(x)
    jax.block_until_ready(loss)
    ref = _reference(x)
    assert jnp.allclose(loss, ref, atol=1e-5, rtol=1e-5), (loss, ref)

    # Secondary check: non-128-aligned spatial size exercises the padding mask.
    x2 = jax.random.normal(jax.random.PRNGKey(1), (2, 5, 7, 9), dtype=jnp.float32)
    loss2 = entropy_min_loss(x2)
    jax.block_until_ready(loss2)
    ref2 = _reference(x2)
    assert jnp.allclose(loss2, ref2, atol=1e-5, rtol=1e-5), (loss2, ref2)

    print("KERNEL_OK")
</pallas_src>

<mosaic_0001>
module attributes {stable_mosaic.version = 11 : i64} {
  func.func @_entropy_tile_kernel(%arg0: i32, %arg1: i32, %arg2: memref<1x4x2x128xf32, #tpu.memory_space<vmem>>, %arg3: memref<1x1x1x128xf32, #tpu.memory_space<vmem>>) attributes {dimension_semantics = [#tpu.dimension_semantics<parallel>, #tpu.dimension_semantics<parallel>], iteration_bounds = array<i64: 2, 1>, scalar_prefetch = 0 : i64, scratch_operands = 0 : i64, tpu.core_type = #tpu.core_type<tc>, window_params = [{transform_indices = @transform_0, window_bounds = array<i64: 1, 4, 2, 128>}, {transform_indices = @transform_1, window_bounds = array<i64: 1, 1, 1, 128>}]} {
    %c0 = arith.constant 0 : index
    %c0_0 = arith.constant 0 : index
    %c0_1 = arith.constant 0 : index
    %c0_2 = arith.constant 0 : index
    %0 = vector.load %arg2[%c0, %c0_0, %c0_1, %c0_2] : memref<1x4x2x128xf32, #tpu.memory_space<vmem>>, vector<1x4x2x128xf32>
    %cst = arith.constant dense<0xFF800000> : vector<1x2x128xf32>
    %1 = vector.multi_reduction <maximumf>, %0, %cst [1] : vector<1x4x2x128xf32> to vector<1x2x128xf32>
    %2 = vector.shape_cast %1 : vector<1x2x128xf32> to vector<1x1x2x128xf32>
    %3 = vector.broadcast %2 : vector<1x1x2x128xf32> to vector<1x4x2x128xf32>
    %4 = arith.subf %0, %3 : vector<1x4x2x128xf32>
    %5 = math.exp %4 : vector<1x4x2x128xf32>
    %cst_3 = arith.constant dense<0.000000e+00> : vector<1x2x128xf32>
    %6 = vector.multi_reduction <add>, %5, %cst_3 [1] : vector<1x4x2x128xf32> to vector<1x2x128xf32>
    %7 = arith.mulf %4, %5 : vector<1x4x2x128xf32>
    %cst_4 = arith.constant dense<0.000000e+00> : vector<1x2x128xf32>
    %8 = vector.multi_reduction <add>, %7, %cst_4 [1] : vector<1x4x2x128xf32> to vector<1x2x128xf32>
    %9 = math.log %6 : vector<1x2x128xf32>
    %10 = tpu.reciprocal %6 : vector<1x2x128xf32> -> vector<1x2x128xf32>
    %11 = arith.mulf %8, %10 : vector<1x2x128xf32>
    %12 = arith.subf %9, %11 : vector<1x2x128xf32>
    %13 = tpu.iota {dimensions = array<i32: 0>} : vector<2x128xi32>
    %14 = tpu.iota {dimensions = array<i32: 1>} : vector<2x128xi32>
    %c2_i32 = arith.constant 2 : i32
    %15 = arith.muli %arg1, %c2_i32 : i32
    %16 = vector.broadcast %15 : i32 to vector<2x128xi32>
    %17 = arith.addi %16, %13 : vector<2x128xi32>
    %c128_i32 = arith.constant 128 : i32
    %18 = vector.broadcast %c128_i32 : i32 to vector<2x128xi32>
    %19 = arith.muli %17, %18 : vector<2x128xi32>
    %20 = arith.addi %19, %14 : vector<2x128xi32>
    %c256_i32 = arith.constant 256 : i32
    %21 = vector.broadcast %c256_i32 : i32 to vector<2x128xi32>
    %22 = arith.cmpi slt, %20, %21 : vector<2x128xi32>
    %23 = vector.shape_cast %22 : vector<2x128xi1> to vector<1x2x128xi1>
    %cst_5 = arith.constant 0.000000e+00 : f32
    %24 = vector.broadcast %cst_5 : f32 to vector<1x2x128xf32>
    %25 = arith.select %23, %12, %24 : vector<1x2x128xi1>, vector<1x2x128xf32>
    %cst_6 = arith.constant dense<0.000000e+00> : vector<1x128xf32>
    %26 = vector.multi_reduction <add>, %25, %cst_6 [1] : vector<1x2x128xf32> to vector<1x128xf32>
    %27 = vector.shape_cast %26 : vector<1x128xf32> to vector<1x1x1x128xf32>
    %c0_7 = arith.constant 0 : index
    %c0_8 = arith.constant 0 : index
    %c0_9 = arith.constant 0 : index
    %c0_10 = arith.constant 0 : index
    %28 = vector.load %arg3[%c0_7, %c0_8, %c0_9, %c0_10] : memref<1x1x1x128xf32, #tpu.memory_space<vmem>>, vector<1x1x1x128xf32>
    tpu.vector_store %arg3[%c0_7, %c0_8, %c0_9, %c0_10], %27 {strides = array<i32>} : memref<1x1x1x128xf32, #tpu.memory_space<vmem>>, vector<1x1x1x128xf32>,
    return
  }
  func.func @transform_0(%arg0: i32, %arg1: i32) -> (i32, i32, i32, i32) {
    %c0_i32 = arith.constant 0 : i32
    %c0_i32_0 = arith.constant 0 : i32
    %c0_i32_1 = arith.constant 0 : i32
    return %arg0, %c0_i32, %arg1, %c0_i32_0 : i32, i32, i32, i32
  }
  func.func @transform_1(%arg0: i32, %arg1: i32) -> (i32, i32, i32, i32) {
    %c0_i32 = arith.constant 0 : i32
    %c0_i32_0 = arith.constant 0 : i32
    %c0_i32_1 = arith.constant 0 : i32
    return %arg0, %arg1, %c0_i32, %c0_i32_0 : i32, i32, i32, i32
  }
}

</mosaic_0001>

<bundles_post_ra>
// kernel: tpu_custom_call.1
= control target key start
LH: loop header
LB: loop body
LE: loop exit
PB: predicated region body
PF: predicated region fallthrough
CT: control target
= control target key end

     0   :  { %6 = vsyncpa [#allocation3], 0  ;;  %s667_s0 = inlined_call_operand.hbm [shape: f32[2,4,2,128], index: 0, kind: input, shape index: {}]   ;;  %s668_s1 = inlined_call_operand.hbm [shape: f32[2,1,1,128], index: 1, kind: output, shape index: {}]  }
   0x1   :  { %8 = vsyncpa [#allocation3 + $0x1], 0 }
   0x2   :  { %9 = vsyncpa [#allocation4], 0 }
   0x3   :  { %11 = vsyncpa [#allocation4 + $0x1], 0  ;;  %s521_s6 = smov 0   ;;  %s523_s7 = smov 0  }
   0x4   :  { %s525_s8 = smov 0   ;;  %s527_s9 = smov 0  }
   0x5   :  { %s529_s10 = smov 0   ;;  %s531_s11 = smov 0  }
   0x6 LB: > { %s308_s12 = sadd.s32 4294967295, %s505_s11   ;;  %s309_s13 = sadd.s32 4294967294, %s505_s11   ;;  %s505_s11 = sphi %s531_s11, %s17_s11   ;;  %s501_s10 = sphi %s529_s10, %s679_s10   ;;  %s497_s9 = sphi %s527_s9, %s678_s9   ;;  %s493_s8 = sphi %s525_s8, %s677_s8   ;;  %s489_s7 = sphi %s523_s7, %s676_s7   ;;  %s485_s6 = sphi %s521_s6, %s675_s6  }
   0x7   : > { %s29_s14 = sadd.s32 1, %s501_s10  ;;  %s38_s15 = sadd.s32 1, %s493_s8 }
   0x8   : > { %p31_p0 = scmp.ge.s32.totalorder %s29_s14, 2  ;;  %p45_p1 = scmp.ne.s32.totalorder %s493_s8, %s489_s7 }
   0x9   : > { %p46_p2 = scmp.eq.s32.totalorder %s505_s11, 0  ;;  %p51_p3 = scmp.ne.s32.totalorder %s489_s7, %s485_s6 }
   0xa   : > { %s681_s14 = smov (%p31_p0, %s29_s14), 0  ;;  %p52_p5 = scmp.eq.s32.totalorder %s308_s12, 0 }
   0xb   : > { %p562_p4 = por %p46_p2, %p45_p1  ;;  %s33_s17 = ssub.s32 %s501_s10, %s681_s14 }
   0xc   : > { %p77_p6 = scmp.eq.s32.totalorder %s308_s12, 1  ;;  %p36_p7 = scmp.eq.s32.totalorder %s33_s17, 0 }
   0xd   : > { %p568_p8 = por %p52_p5, %p51_p3  ;;  %p83_p10 = scmp.eq.s32.totalorder %s309_s13, 1 }
   0xe   : > { %p572_p9 = por %p77_p6, %p45_p1  ;;  %p333_p13 = scmp.lt.s32.totalorder %s505_s11, 2 }
   0xf   : > { %s577_s20 = scalar_select %p36_p7, %s493_s8, %s38_s15  }
  0x10   : > { %p579_p11 = por %p83_p10, %p51_p3  ;;  %s103_s22 = sand.u32 1, %s493_s8  }
  0x11   : > { %s312_s23 = sshll.u32 %s103_s22, 3  ;;  %s320_s24 = sshll.u32 %s501_s10, 7 }
  0x12   : > { %s114_s27 = scalar_lea.hbm %s667_s0, %s320_s24  ;;  %s107_s28 = scalar_lea.vmem [#allocation2], %s312_s23 }
  0x13   : > { %s115_s29 = sshll.u32 %s107_s28, 4  ;;  %p592_p0 = pnand %p333_p13, %p562_p4  ;;  %s116_s29 = int_to_ptr.vmem [resolvable:$true] %s115_s29 }
  0x14   : > { %p315_p1 = scmp.ge.s32.totalorder %s505_s11, 1  ;;  %s104_s2 = scalar_lea.sflag [#allocation3], %s103_s22 }
  0x15   : > { %p399_p2 = pneg %p592_p0  ;;  %s410_s3 = scalar_lea.vmem %s116_s29, 128 }
  0x16   : > { %p411_p3 = scmp.ne.s32.totalorder %s116_s29, %s410_s3  ;;  %s507_s4 = smov [#allocation2]  }
  0x17   : > { %s415_s5 = sshll.u32 %s507_s4, 4  ;;  %s416_s5 = int_to_ptr.vmem [resolvable:$false] %s415_s5 }
  0x18   : > { %p413_p5 = pnand %p411_p3, %p399_p2  ;;  %s417_s12 = scalar_lea.vmem %s416_s5, 256 }
  0x19   : > { %p418_p7 = scmp.lt.s32.totalorder %s116_s29, %s416_s5  ;;  %p419_p10 = scmp.lt.s32.totalorder %s417_s12, %s410_s3 }
  0x1a   : > { %p414_p6 = pneg %p413_p5 }
  0x1b   : > { %p420_p12 = por %p419_p10, %p418_p7 }
  0x1d   : > { %p421_p4 = pnand %p420_p12, %p414_p6 }
  0x1f   : > { %424 = shalt.err (!%p421_p4)
}
  0x20   : > { %s508_s13 = smov 32   ;;  %s509_s15 = smov 2  }
  0x21   : > { %328 = dma.hbm_to_vmem [thread:$0]  (!%p592_p0), %s114_s27, 128, %s116_s29, %s104_s2, %s508_s13, %s508_s13, %s509_s15  }
  0x22   : > { %p123_p13 = scmp.lt.s32.totalorder %s505_s11, 3 }
  0x24   : > { %p124_p2 = pnand %p315_p1, %p123_p13 }
  0x25   : > { %s605_s16 = sand.u32 (!%p124_p2), 1, %s489_s7  }
  0x26   : > { %127 = sbr.rel (%p124_p2) target bundleno = 123 (0x7b), region = 24  ;;  %s316_s17 = sshll.u32 (!%p124_p2), %s605_s16, 3 }
  0x27   : > { %s130_s22 = scalar_lea.sflag (!%p124_p2), [#allocation3], %s605_s16  ;;  %s133_s23 = scalar_lea.vmem (!%p124_p2), [#allocation2], %s316_s17 }
  0x2b   : > { %476 = dma.done.wait (%p568_p8), %s130_s22, 128  }
  0x2c   : > { %478 = vsyncadd (%p568_p8), %s130_s22, 4294967168  ;;  %vm155_vm0 = vcmask 1041408   ;;  %v151_v0 = vld [vmem:[%s133_s23] sm:$0x3]  ;;  %v152_v1 = vld [vmem:[%s133_s23 + $0x2] sm:$0x3]  ;;  %v198_v32 = vlaneseq }
  0x2d   : > { %v153_v2 = vld [vmem:[%s133_s23 + $0x4] sm:$0x3]  ;;  %v154_v3 = vld [vmem:[%s133_s23 + $0x6] sm:$0x3]  ;;  %v156_v4 = vsel %vm155_vm0, %v151_v0, -inf  ;;  %v157_v5 = vsel %vm155_vm0, %v152_v1, -inf }
  0x2e   : > { %v158_v6 = vsel %vm155_vm0, %v153_v2, -inf  ;;  %v159_v7 = vsel %vm155_vm0, %v154_v3, -inf  ;;  %v160_v8 = vmax.f32 %v156_v4, %v157_v5  ;;  %v199_v39 = vshrl.u32 %v198_v32, 7  ;;  %s150_s18 = scalar_lea.vmem [#allocation5], %s605_s16  ;;  %s317_s25 = sshll.u32 %s497_s9, 4 }
  0x2f   : > { %v161_v9 = vmax.f32 %v158_v6, %v159_v7  ;;  %v201_v42 = vand.u32 127, %v198_v32  ;;  %s231_s24 = sshll.u32 %s150_s18, 4  ;;  %s229_s28 = scalar_lea.hbm %s668_s1, %s317_s25  ;;  %s232_s24 = int_to_ptr.vmem [resolvable:$true] %s231_s24 }
  0x30   : > { %v205_v43 = vmul.u32 128, %v199_v39  ;;  %s218_s29 = scalar_lea.sflag [#allocation4], %s605_s16  ;;  %s425_s30 = scalar_lea.vmem %s232_s24, 16 }
  0x31   : > { %v162_v10 = vmax.f32 %v160_v8, %v161_v9  ;;  %p426_p8 = scmp.ne.s32.totalorder %s232_s24, %s425_s30  ;;  %s510_s2 = smov [#allocation5]  }
  0x32   : > { %v206_v45 = vadd.s32 %v205_v43, %v201_v42  ;;  %s429_s3 = sshll.u32 %s510_s2, 4  ;;  %s430_s3 = int_to_ptr.vmem [resolvable:$false] %s429_s3 }
  0x33   : > { %v163_v11 = vsub.f32 %v151_v0, %v162_v10  ;;  %v164_v12 = vsub.f32 %v152_v1, %v162_v10  ;;  %v165_v13 = vsub.f32 %v153_v2, %v162_v10  ;;  %v166_v14 = vsub.f32 %v154_v3, %v162_v10  ;;  %p427_p12 = pnand %p426_p8, %p572_p9  ;;  %s431_s4 = scalar_lea.vmem %s430_s3, 32 }
  0x34   : > { %vm207_vm1 = vcmp.lt.s32.totalorder %v206_v45, 256  ;;  %p432_p1 = scmp.lt.s32.totalorder %s232_s24, %s430_s3  ;;  %p433_p3 = scmp.lt.s32.totalorder %s431_s4, %s425_s30 }
  0x35   : > { %v167_v15 = vmul.f32 1.442695, %v163_v11  ;;  %v169_v16 = vmul.f32 1.442695, %v164_v12  ;;  %v171_v17 = vmul.f32 1.442695, %v165_v13  ;;  %p428_p0 = pneg %p427_p12 }
  0x36   : > { %v173_v18 = vmul.f32 1.442695, %v166_v14  ;;  %p434_p5 = por %p433_p3, %p432_p1 }
  0x37   : > { %385 = vpow2.f32 %v167_v15 }
  0x38   : > { %387 = vpow2.f32 %v169_v16  ;;  %p435_p6 = pnand %p434_p5, %p428_p0 }
  0x39   : > { %389 = vpow2.f32 %v171_v17 }
  0x3a   : > { %391 = vpow2.f32 %v173_v18 }
  0x44   : > { %v386_v19 = vpop.eup %385 }
  0x45   : > { %v388_v20 = vpop.eup %387  ;;  %v175_v21 = vsel %vm155_vm0, %v386_v19, 0.0  ;;  %v182_v29 = vmul.f32 %v386_v19, %v163_v11 }
  0x46   : > { %v390_v22 = vpop.eup %389  ;;  %v176_v23 = vsel %vm155_vm0, %v388_v20, 0.0  ;;  %v183_v30 = vmul.f32 %v388_v20, %v164_v12 }
  0x47   : > { %v392_v24 = vpop.eup %391  ;;  %v177_v25 = vadd.f32 %v176_v23, %v175_v21  ;;  %v178_v26 = vsel %vm155_vm0, %v390_v22, 0.0  ;;  %v184_v33 = vmul.f32 %v390_v22, %v165_v13  ;;  %v186_v34 = vsel %vm155_vm0, %v182_v29, 0.0 }
  0x48   : > { %v180_v27 = vsel %vm155_vm0, %v392_v24, 0.0  ;;  %v187_v35 = vsel %vm155_vm0, %v183_v30, 0.0  ;;  %v185_v37 = vmul.f32 %v392_v24, %v166_v14 }
  0x49   : > { %v179_v28 = vadd.f32 %v178_v26, %v177_v25  ;;  %v188_v36 = vadd.f32 %v187_v35, %v186_v34  ;;  %v189_v38 = vsel %vm155_vm0, %v184_v33, 0.0 }
  0x4a   : > { %v191_v41 = vsel %vm155_vm0, %v185_v37, 0.0 }
  0x4b   : > { %v181_v31 = vadd.f32 %v180_v27, %v179_v28  ;;  %v190_v40 = vadd.f32 %v189_v38, %v188_v36 }
  0x4d   : > { %393 = vlog2.f32 %v181_v31  ;;  %v192_v44 = vadd.f32 %v191_v41, %v190_v40 }
  0x4e   : > { %395 = vrcp.f32 %v181_v31 }
  0x5a   : > { %v394_v46 = vpop.eup %393 }
  0x5b   : > { %v396_v47 = vpop.eup %395  ;;  %v194_v48 = vmul.f32 0.6931472, %v394_v46 }
  0x5c   : > { %v196_v49 = vmul.f32 %v396_v47, %v192_v44 }
  0x5e   : > { %v197_v50 = vsub.f32 %v194_v48, %v196_v49 }
  0x60   : > { %v208_v51 = vsel %vm207_vm1, %v197_v50, 0.0 }
  0x61   : > { %v209_v52 = vsel %vm155_vm0, %v208_v51, 0.0 }
  0x62   : > { %v210_v53 = vrot.slane %v209_v52, 4 }
  0x64   : > { %v211_v54 = vadd.f32 %v210_v53, %v209_v52 }
  0x66   : > { %v212_v55 = vrot.slane %v211_v54, 2 }
  0x68   : > { %v213_v56 = vadd.f32 %v212_v55, %v211_v54 }
  0x6a   : > { %v214_v57 = vrot.slane %v213_v56, 1 }
  0x6c   : > { %v215_v58 = vadd.f32 %v214_v57, %v213_v56 }
  0x6e   : > { %216 = vst [vmem:[%s150_s18] sm:$0x1] %v215_v58 }
  0x6f   : > { %438 = shalt.err (!%p435_p6)
}
  0x70   : > { %s439_s9 = scalar_lea.hbm %s229_s28, 16  ;;  %s443_s13 = scalar_lea.hbm %s668_s1, 32 }
  0x71   : > { %p440_p7 = scmp.ne.s32.totalorder %s229_s28, %s439_s9  ;;  %p444_p13 = scmp.lt.s32.totalorder %s229_s28, %s668_s1 }
  0x72   : > { %p445_p2 = scmp.lt.s32.totalorder %s443_s13, %s439_s9 }
  0x73   : > { %p441_p10 = pnand %p440_p7, %p572_p9 }
  0x74   : > { %p446_p8 = por %p445_p2, %p444_p13 }
  0x75   : > { %p442_p4 = pneg %p441_p10 }
  0x77   : > { %p447_p12 = pnand %p446_p8, %p442_p4 }
  0x79   : > { %450 = shalt.err (!%p447_p12)
}
  0x7a   : > { %323 = dma.vmem_to_hbm [thread:$0]  (%p572_p9), %s232_s24, 16, %s229_s28, %s218_s29  }
  0x7b PF: > { %s243_s17 = sand.u32 1, %s485_s6   ;;  %p674_p0 = scmp.ge.s32.totalorder %s505_s11, 2 }
  0x7c   : > { %s244_s22 = scalar_lea.sflag [#allocation4], %s243_s17 }
  0x7d   : > { %p330_p1 = pnand %p674_p0, %p579_p11 }
  0x7f   : > { %p331_p3 = pneg %p330_p1 }
  0x81   : > { %480 = dma.done.wait (%p331_p3), %s244_s22, 16  }
  0x82   : > { %482 = vsyncadd (%p331_p3), %s244_s22, 4294967280  ;;  %s17_s11 = sadd.s32 1, %s505_s11   ;;  %s675_s6 = smov %s489_s7 }
  0x83   : > { %p14_p5 = scmp.ge.s32.totalorder %s17_s11, 4   ;;  %s676_s7 = smov %s493_s8 }
  0x84   : > { %s677_s8 = smov %s577_s20  ;;  %s678_s9 = smov %s501_s10 }
  0x85   : > { %s679_s10 = smov %s681_s14  ;;  %16 = sbr.rel (!%p14_p5) target bundleno = 6 (0x6), region = 69 }
  0x8a   :  { %248 = vsyncpa [#allocation3], 1 }
  0x8b   :  { %250 = vsyncpa [#allocation3 + $0x1], 1 }
  0x8c   :  { %251 = vsyncpa [#allocation4], 1 }
  0x8d   :  { %253 = vsyncpa [#allocation4 + $0x1], 1 }

</bundles_post_ra>
